<compile_context>
chip_gen: v7x
topology: tpu7x:2x2x1
jax: 0.10.0
libtpu: 0.0.40
codegen_flags: <defaults>
</compile_context>

<pallas_src>
import jax
import jax.numpy as jnp
import numpy as np
from jax.experimental import pallas as pl
from jax.experimental.pallas import tpu as pltpu


def _round_up(n, m):
    return ((n + m - 1) // m) * m


def dqn_kernel(x_ref, w1_ref, w2_ref, w3_ref, bias_ref, o_ref):
    # x block: (TILE_B, 11) f32 -> bf16 for the MXU.
    x = x_ref[...].astype(jnp.bfloat16)
    b1 = bias_ref[0:1, :]        # (1, 128) f32
    b2 = bias_ref[1:2, :64]      # (1, 64)  f32
    b3 = bias_ref[2:3, :4]       # (1, 4)   f32

    # Layer 1: (TB, 11) @ (11, 128) -> ReLU  (f32 accumulate, f32 epilogue)
    h1 = jnp.dot(x, w1_ref[...], preferred_element_type=jnp.float32)
    h1 = jnp.maximum(h1 + b1, 0.0).astype(jnp.bfloat16)
    # Layer 2: (TB, 128) @ (128, 64) -> ReLU
    h2 = jnp.dot(h1, w2_ref[...], preferred_element_type=jnp.float32)
    h2 = jnp.maximum(h2 + b2, 0.0).astype(jnp.bfloat16)
    # Layer 3: (TB, 64) @ (64, 4) -> only the 4 real Q-values are stored.
    out = jnp.dot(h2, w3_ref[...], preferred_element_type=jnp.float32)
    o_ref[...] = (out + b3).astype(o_ref.dtype)


def pack_params(params):
    """f32 params in (in_features, out_features) layout -> kernel-ready buffers:
    bf16 weights (w3 kept narrow at (64, 4)) + one packed (8, 128) f32 bias buffer."""
    w1, b1, w2, b2, w3, b3 = params
    w1b = w1.astype(jnp.bfloat16)      # (11, 128)
    w2b = w2.astype(jnp.bfloat16)      # (128, 64)
    w3b = w3.astype(jnp.bfloat16)      # (64, 4)  -- no lane padding
    bias = jnp.zeros((8, 128), jnp.float32)
    bias = bias.at[0, :].set(b1[0])
    bias = bias.at[1, :64].set(b2[0])
    bias = bias.at[2, :4].set(b3[0])
    return (w1b, w2b, w3b, bias)


def dqn_forward(x, packed, tile_b=2048):
    w1, w2, w3, bias = packed
    B, F = x.shape
    assert F == 11
    # Pick a sublane-aligned batch tile:
    #  - never larger than needed,
    #  - at least 2 grid steps whenever B > 8 so the "parallel" batch axis is
    #    sharded across both TensorCores on v7x (harmless on single-TC v5e/v6e).
    if B > 8:
        max_tb = _round_up(pl.cdiv(B, 2), 8)
    else:
        max_tb = _round_up(B, 8)
    tb = min(tile_b, max_tb)
    Bp = _round_up(B, tb)
    if Bp != B:
        x = jnp.pad(x, ((0, Bp - B), (0, 0)))

    out = pl.pallas_call(
        dqn_kernel,
        out_shape=jax.ShapeDtypeStruct((Bp, 4), jnp.float32),
        grid=(Bp // tb,),
        in_specs=[
            pl.BlockSpec((tb, 11), lambda i: (i, 0)),     # x: streamed over the batch
            pl.BlockSpec((11, 128), lambda i: (0, 0)),    # w1: resident across grid steps
            pl.BlockSpec((128, 64), lambda i: (0, 0)),    # w2: resident
            pl.BlockSpec((64, 4), lambda i: (0, 0)),      # w3 (narrow): resident
            pl.BlockSpec((8, 128), lambda i: (0, 0)),     # packed biases: resident
        ],
        out_specs=pl.BlockSpec((tb, 4), lambda i: (i, 0)),
        compiler_params=pltpu.CompilerParams(
            dimension_semantics=("parallel",),            # v7x dual-TC sharding
            vmem_limit_bytes=32 << 20,
        ),
    )(x, w1, w2, w3, bias)
    # Strip batch padding only; all 4 output lanes are real Q-values.
    return out[:B]


def init_params(key):
    # Deterministic init mimicking nn.Linear default: U(-1/sqrt(fan_in), 1/sqrt(fan_in)).
    # Weights stored as (in_features, out_features) == PyTorch W.T, so forward is x @ W + b.
    dims = [(11, 128), (128, 64), (64, 4)]
    keys = jax.random.split(key, 2 * len(dims))
    params = []
    for i, (fan_in, fan_out) in enumerate(dims):
        bound = 1.0 / np.sqrt(fan_in)
        w = jax.random.uniform(keys[2 * i], (fan_in, fan_out),
                               minval=-bound, maxval=bound, dtype=jnp.float32)
        b = jax.random.uniform(keys[2 * i + 1], (1, fan_out),
                               minval=-bound, maxval=bound, dtype=jnp.float32)
        params += [w, b]
    return tuple(params)


def reference_forward_f32(x, params):
    w1, b1, w2, b2, w3, b3 = params
    h1 = jnp.maximum(x @ w1 + b1, 0.0)
    h2 = jnp.maximum(h1 @ w2 + b2, 0.0)
    return h2 @ w3 + b3


def reference_forward_bf16(x, params):
    # Mirrors the kernel's precision: bf16 matmul operands, f32 accumulation + epilogue.
    w1, b1, w2, b2, w3, b3 = params

    def mm(a, w):
        return jax.lax.dot(a.astype(jnp.bfloat16), w.astype(jnp.bfloat16),
                           preferred_element_type=jnp.float32)

    h1 = jnp.maximum(mm(x, w1) + b1, 0.0)
    h2 = jnp.maximum(mm(h1, w2) + b2, 0.0)
    return mm(h2, w3) + b3


if __name__ == "__main__":
    key = jax.random.PRNGKey(0)
    k_params, k_x1, k_x2 = jax.random.split(key, 3)
    params = init_params(k_params)
    packed = pack_params(params)

    # Small batch: single grid step, exercises the tiny-tile path.
    x_small = jax.random.normal(k_x1, (8, 11), dtype=jnp.float32)
    out_small = jax.block_until_ready(dqn_forward(x_small, packed))
    ref_small = reference_forward_bf16(x_small, params)
    np.testing.assert_allclose(np.asarray(out_small), np.asarray(ref_small),
                               rtol=1e-3, atol=1e-3)

    # Medium batch: >= 2 grid steps (v7x dual-TC path) + tail padding (200 -> 208, grid=(2,)).
    x_big = jax.random.normal(k_x2, (200, 11), dtype=jnp.float32)
    out_big = jax.block_until_ready(dqn_forward(x_big, packed))
    ref_big = reference_forward_bf16(x_big, params)
    np.testing.assert_allclose(np.asarray(out_big), np.asarray(ref_big),
                               rtol=1e-3, atol=1e-3)

    # Loose sanity check against the original full-f32 module math (bf16 quantization noise).
    ref_f32 = reference_forward_f32(x_small, params)
    np.testing.assert_allclose(np.asarray(out_small), np.asarray(ref_f32),
                               rtol=5e-2, atol=5e-2)

    print("KERNEL_OK")
</pallas_src>

<mosaic_0001>
module attributes {stable_mosaic.version = 11 : i64} {
  func.func @dqn_kernel(%arg0: i32, %arg1: memref<8x11xf32, #tpu.memory_space<vmem>>, %arg2: memref<11x128xbf16, #tpu.memory_space<vmem>>, %arg3: memref<128x64xbf16, #tpu.memory_space<vmem>>, %arg4: memref<64x4xbf16, #tpu.memory_space<vmem>>, %arg5: memref<8x128xf32, #tpu.memory_space<vmem>>, %arg6: memref<8x4xf32, #tpu.memory_space<vmem>>) attributes {dimension_semantics = [#tpu.dimension_semantics<parallel>], iteration_bounds = array<i64: 1>, scalar_prefetch = 0 : i64, scratch_operands = 0 : i64, tpu.core_type = #tpu.core_type<tc>, window_params = [{transform_indices = @transform_0, window_bounds = array<i64: 8, 11>}, {pipeline_mode = #tpu.pipeline_mode<synchronous>, transform_indices = @transform_1, window_bounds = array<i64: 11, 128>}, {pipeline_mode = #tpu.pipeline_mode<synchronous>, transform_indices = @transform_2, window_bounds = array<i64: 128, 64>}, {pipeline_mode = #tpu.pipeline_mode<synchronous>, transform_indices = @transform_3, window_bounds = array<i64: 64, 4>}, {pipeline_mode = #tpu.pipeline_mode<synchronous>, transform_indices = @transform_4, window_bounds = array<i64: 8, 128>}, {transform_indices = @transform_5, window_bounds = array<i64: 8, 4>}]} {
    %c0 = arith.constant 0 : index
    %c0_0 = arith.constant 0 : index
    %0 = vector.load %arg1[%c0, %c0_0] : memref<8x11xf32, #tpu.memory_space<vmem>>, vector<8x11xf32>
    %1 = arith.truncf %0 : vector<8x11xf32> to vector<8x11xbf16>
    %c0_1 = arith.constant 0 : index
    %c0_2 = arith.constant 0 : index
    %2 = vector.load %arg5[%c0_1, %c0_2] : memref<8x128xf32, #tpu.memory_space<vmem>>, vector<1x128xf32>
    %c1 = arith.constant 1 : index
    %c0_3 = arith.constant 0 : index
    %3 = vector.load %arg5[%c1, %c0_3] : memref<8x128xf32, #tpu.memory_space<vmem>>, vector<1x64xf32>
    %c2 = arith.constant 2 : index
    %c0_4 = arith.constant 0 : index
    %4 = vector.load %arg5[%c2, %c0_4] : memref<8x128xf32, #tpu.memory_space<vmem>>, vector<1x4xf32>
    %c0_5 = arith.constant 0 : index
    %c0_6 = arith.constant 0 : index
    %5 = vector.load %arg2[%c0_5, %c0_6] : memref<11x128xbf16, #tpu.memory_space<vmem>>, vector<11x128xbf16>
    %cst = arith.constant dense<0.000000e+00> : vector<8x128xf32>
    %6 = tpu.matmul %1, %5, %cst {dimension_numbers = #tpu.dot_dimension_numbers<[1], [0], [0], [1], [0, 0, 1, 1], [], []>} : vector<8x11xbf16>, vector<11x128xbf16>, vector<8x128xf32> -> vector<8x128xf32>
    %7 = vector.broadcast %2 : vector<1x128xf32> to vector<8x128xf32>
    %8 = arith.addf %6, %7 : vector<8x128xf32>
    %cst_7 = arith.constant 0.000000e+00 : f32
    %9 = vector.broadcast %cst_7 : f32 to vector<8x128xf32>
    %10 = arith.maximumf %8, %9 : vector<8x128xf32>
    %11 = arith.truncf %10 : vector<8x128xf32> to vector<8x128xbf16>
    %c0_8 = arith.constant 0 : index
    %c0_9 = arith.constant 0 : index
    %12 = vector.load %arg3[%c0_8, %c0_9] : memref<128x64xbf16, #tpu.memory_space<vmem>>, vector<128x64xbf16>
    %cst_10 = arith.constant dense<0.000000e+00> : vector<8x64xf32>
    %13 = tpu.matmul %11, %12, %cst_10 {dimension_numbers = #tpu.dot_dimension_numbers<[1], [0], [0], [1], [0, 0, 1, 1], [], []>} : vector<8x128xbf16>, vector<128x64xbf16>, vector<8x64xf32> -> vector<8x64xf32>
    %14 = vector.broadcast %3 : vector<1x64xf32> to vector<8x64xf32>
    %15 = arith.addf %13, %14 : vector<8x64xf32>
    %cst_11 = arith.constant 0.000000e+00 : f32
    %16 = vector.broadcast %cst_11 : f32 to vector<8x64xf32>
    %17 = arith.maximumf %15, %16 : vector<8x64xf32>
    %18 = arith.truncf %17 : vector<8x64xf32> to vector<8x64xbf16>
    %c0_12 = arith.constant 0 : index
    %c0_13 = arith.constant 0 : index
    %19 = vector.load %arg4[%c0_12, %c0_13] : memref<64x4xbf16, #tpu.memory_space<vmem>>, vector<64x4xbf16>
    %cst_14 = arith.constant dense<0.000000e+00> : vector<8x4xf32>
    %20 = tpu.matmul %18, %19, %cst_14 {dimension_numbers = #tpu.dot_dimension_numbers<[1], [0], [0], [1], [0, 0, 1, 1], [], []>} : vector<8x64xbf16>, vector<64x4xbf16>, vector<8x4xf32> -> vector<8x4xf32>
    %21 = vector.broadcast %4 : vector<1x4xf32> to vector<8x4xf32>
    %22 = arith.addf %20, %21 : vector<8x4xf32>
    %c0_15 = arith.constant 0 : index
    %c0_16 = arith.constant 0 : index
    %23 = vector.load %arg6[%c0_15, %c0_16] : memref<8x4xf32, #tpu.memory_space<vmem>>, vector<8x4xf32>
    tpu.vector_store %arg6[%c0_15, %c0_16], %22 {strides = array<i32>} : memref<8x4xf32, #tpu.memory_space<vmem>>, vector<8x4xf32>,
    return
  }
  func.func @transform_0(%arg0: i32) -> (i32, i32) {
    %c0_i32 = arith.constant 0 : i32
    %c0_i32_0 = arith.constant 0 : i32
    return %arg0, %c0_i32 : i32, i32
  }
  func.func @transform_1(%arg0: i32) -> (i32, i32) {
    %c0_i32 = arith.constant 0 : i32
    %c0_i32_0 = arith.constant 0 : i32
    %c0_i32_1 = arith.constant 0 : i32
    return %c0_i32, %c0_i32_0 : i32, i32
  }
  func.func @transform_2(%arg0: i32) -> (i32, i32) {
    %c0_i32 = arith.constant 0 : i32
    %c0_i32_0 = arith.constant 0 : i32
    %c0_i32_1 = arith.constant 0 : i32
    return %c0_i32, %c0_i32_0 : i32, i32
  }
  func.func @transform_3(%arg0: i32) -> (i32, i32) {
    %c0_i32 = arith.constant 0 : i32
    %c0_i32_0 = arith.constant 0 : i32
    %c0_i32_1 = arith.constant 0 : i32
    return %c0_i32, %c0_i32_0 : i32, i32
  }
  func.func @transform_4(%arg0: i32) -> (i32, i32) {
    %c0_i32 = arith.constant 0 : i32
    %c0_i32_0 = arith.constant 0 : i32
    %c0_i32_1 = arith.constant 0 : i32
    return %c0_i32, %c0_i32_0 : i32, i32
  }
  func.func @transform_5(%arg0: i32) -> (i32, i32) {
    %c0_i32 = arith.constant 0 : i32
    %c0_i32_0 = arith.constant 0 : i32
    return %arg0, %c0_i32 : i32, i32
  }
}

</mosaic_0001>

<bundles_post_ra>
// kernel: tpu_custom_call.1
= control target key start
LH: loop header
LB: loop body
LE: loop exit
PB: predicated region body
PF: predicated region fallthrough
CT: control target
= control target key end

     0   :  { %vm41_vm0 = vcmask 1044480   ;;  %vm42_vm1 = vcmask 1045504   ;;  %v374_v0 = vmov 0.0   ;;  %v375_v2 = vmov 65535   ;;  %s464_s1 = inlined_call_operand.vmem [shape: bf16[11,128], index: 1, kind: input, shape index: {}]   ;;  %s465_s0 = inlined_call_operand.vmem [shape: f32[8,11], index: 0, kind: input, shape index: {}]   ;;  %s466_s2 = inlined_call_operand.vmem [shape: bf16[128,64], index: 2, kind: input, shape index: {}]   ;;  %s467_s3 = inlined_call_operand.vmem [shape: bf16[64,4], index: 3, kind: input, shape index: {}]   ;;  %s468_s4 = inlined_call_operand.vmem [shape: f32[8,128], index: 4, kind: input, shape index: {}]   ;;  %s469_s5 = inlined_call_operand.vmem [shape: f32[8,4], index: 5, kind: output, shape index: {}]  }
   0x1   :  { %320 = vmatprep.subr.bf16.mxu0 %v374_v0  ;;  %v361_v1 = vld [vmem:[%s464_s1] sm:$0x3f]   ;;  %326 = vmatprep.subr.bf16.mxu1 %v374_v0  ;;  %v43_v3 = vsel %vm41_vm0, 4294967295, %v375_v2  ;;  %vm376_vm2 = vmmov 0   ;;  %v363_v9 = vld [vmem:[%s466_s2 + $0x8] sm:$0xff]   ;;  %vm37_vm3 = vcmask 89088  }
   0x2   :  { %v21_v4 = vld [vmem:[%s465_s0] sm:$0xff]  ;;  %v44_v5 = vsel %vm42_vm1, %v43_v3, 0  ;;  %322 = vmatprep.mubr.msk.bf16.mxu0 %vm376_vm2, %v374_v0  ;;  %342 = vmatprep.mubr.msk.bf16.mxu1 %vm376_vm2, %v374_v0  ;;  %v364_v10 = vld [vmem:[%s466_s2 + $0x10] sm:$0xff]   ;;  %v365_v11 = vld [vmem:[%s466_s2 + $0x18] sm:$0xff]   ;;  %vm236_vm4 = vcmask 523264   ;;  %vm280_vm5 = vcmask 31744  }
   0x3   :  { %v362_v6 = vld [vmem:[%s466_s2] sm:$0xff]   ;;  %v46_v7 = vand.u32 %v361_v1, %v44_v5  ;;  %v22_v8 = vpack.c.bf16 %v21_v4, %v21_v4  ;;  %v367_v13 = vld [vmem:[%s466_s2 + $0x28] sm:$0xff]   ;;  %v368_v14 = vld [vmem:[%s466_s2 + $0x30] sm:$0xff]  }
   0x4   :  { %327 = vmatpush3.bf16.msra.mxu1 %v362_v6  ;;  %v366_v12 = vld [vmem:[%s466_s2 + $0x20] sm:$0xff]   ;;  %v369_v15 = vld [vmem:[%s466_s2 + $0x38] sm:$0xff]   ;;  %v371_v17 = vld [vmem:[%s467_s3 + $0x8] sm:$0xff]  }
   0x5   :  { %321 = vmatpush3.bf16.msra.mxu0 %v46_v7  ;;  %328 = vmatprep.subr.bf16.mxu1 %v374_v0  ;;  %v370_v16 = vld [vmem:[%s467_s3] sm:$0xff]   ;;  %v372_v26 = vld [vmem:[%s467_s3 + $0x10] sm:$0xff]   ;;  %v373_v27 = vld [vmem:[%s467_s3 + $0x18] sm:$0xff]  }
   0x6   :  { %346 = vmatprep.subr.bf16.mxu0 %v374_v0  ;;  %v286_v18 = vld [vmem:[%s468_s4] ss:$0 sm:$0xff]  ;;  %v289_v28 = vld [vmem:[%s468_s4 + $0x1] ss:$0 sm:$0xff]  ;;  %v298_v36 = vld [vmem:[%s468_s4 + $0x2] ss:$0 sm:$0xff] }
   0x8   :  { %323 = vmatmul.mubr.msk.bf16.vlgmr.msra.gmra.mrb[0].mxu0 %vm37_vm3, %v22_v8  ;;  %329 = vmatpush3.bf16.msra.mxu1 %v363_v9 }
   0x9   :  { %330 = vmatprep.subr.bf16.mxu1 %v374_v0  ;;  %354 = vmatprep.mubr.msk.bf16.mxu0 %vm376_vm2, %v374_v0 }
   0xa   :  { %347 = vmatpush3.bf16.msra.mxu0 %v370_v16 }
   0xb   :  { %348 = vmatprep.subr.bf16.mxu0 %v374_v0 }
   0xc   :  { %331 = vmatpush3.bf16.msra.mxu1 %v364_v10 }
   0xd   :  { %332 = vmatprep.subr.bf16.mxu1 %v374_v0 }
   0xe   :  { %349 = vmatpush3.bf16.msra.mxu0 %v371_v17 }
   0xf   :  { %350 = vmatprep.subr.bf16.mxu0 %v374_v0 }
  0x10   :  { %333 = vmatpush3.bf16.msra.mxu1 %v365_v11 }
  0x11   :  { %334 = vmatprep.subr.bf16.mxu1 %v374_v0 }
  0x12   :  { %351 = vmatpush3.bf16.msra.mxu0 %v372_v26 }
  0x13   :  { %352 = vmatprep.subr.bf16.mxu0 %v374_v0 }
  0x14   :  { %335 = vmatpush3.bf16.msra.mxu1 %v366_v12 }
  0x15   :  { %336 = vmatprep.subr.bf16.mxu1 %v374_v0 }
  0x16   :  { %353 = vmatpush3.bf16.msra.mxu0 %v373_v27 }
  0x18   :  { %337 = vmatpush3.bf16.msra.mxu1 %v367_v13 }
  0x19   :  { %338 = vmatprep.subr.bf16.mxu1 %v374_v0 }
  0x1c   :  { %339 = vmatpush3.bf16.msra.mxu1 %v368_v14 }
  0x1d   :  { %340 = vmatprep.subr.bf16.mxu1 %v374_v0 }
  0x20   :  { %341 = vmatpush3.bf16.msra.mxu1 %v369_v15 }
  0xdb   :  { %v82_v19 = vpop.f32.mrb[0].mxu0 }
  0xdc   :  { %v83_v20 = vadd.f32 %v286_v18, %v82_v19  ;;  %v324_v21 = vpop.f32.mrb[1].mxu0 }
  0xdd   :  { %v85_v22 = vpop.f32.mrb[2].mxu0 }
  0xde   :  { %v88_v23 = vmax.f32 %v83_v20, 0.0  ;;  %v325_v24 = vpop.f32.mrb[3].mxu0 }
  0xe0   :  { %v89_v25 = vpack.c.bf16 %v88_v23, %v88_v23 }
  0xe2   :  { %343 = vmatmul.mubr.bf16.vlgmr.msra.gmra.mrb[0].mxu1 %v89_v25 }
 0x1b5   :  { %v192_v29 = vpop.f32.mrb[0].mxu1 }
 0x1b6   :  { %v193_v30 = vadd.f32 %v289_v28, %v192_v29  ;;  %v344_v31 = vpop.f32.mrb[1].mxu1 }
 0x1b7   :  { %v195_v32 = vpop.f32.mrb[2].mxu1 }
 0x1b8   :  { %v198_v33 = vmax.f32 %v193_v30, 0.0  ;;  %v345_v34 = vpop.f32.mrb[3].mxu1 }
 0x1ba   :  { %v199_v35 = vpack.c.bf16 %v198_v33, %v198_v33 }
 0x1bc   :  { %355 = vmatmul.mubr.msk.bf16.vlgmr.msra.gmra.mrb[4].mxu0 %vm236_vm4, %v199_v35 }
 0x28f   :  { %v274_v37 = vpop.f32.mrb[4].mxu0 }
 0x290   :  { %v275_v38 = vadd.f32 %v298_v36, %v274_v37  ;;  %v356_v39 = vpop.f32.mrb[5].mxu0 }
 0x291   :  { %v277_v40 = vpop.f32.mrb[6].mxu0 }
 0x292   :  { %281 = vst.msk [vmem:[%s469_s5] sm:$0xff] %vm280_vm5, %v275_v38  ;;  %v357_v41 = vpop.f32.mrb[7].mxu0 }

</bundles_post_ra>
